<compile_context>
chip_gen: v7x
topology: tpu7x:2x2x1
jax: 0.10.0
libtpu: 0.0.40
codegen_flags: <defaults>
</compile_context>

<pallas_src>
import numpy as np
import jax
import jax.numpy as jnp
from jax.experimental import pallas as pl
from jax.experimental.pallas import tpu as pltpu


# ----------------------------------------------------------------------------
# Fused inner-model + CFG-combine + inpainting-blend kernel
# ----------------------------------------------------------------------------
def _cfg_denoiser_kernel(act_ref, wt_ref, bias_ref, mask_ref, init_ref, den_ref):
    """One grid step = one (HW block, sample).

    denoised = init*mask + (1-mask) * ( M_i @ [x ; image_cond] + bias_i )

    where M_i folds c_skip/c_out/Wx/Wi and bias_i folds the cross-attention term and
    the whole CFG combine (per-item coefficients sum to 1, so x_out never exists).
    """
    act = act_ref[0]                                          # (C+Ci, hw_blk), lane-dense
    out = jnp.dot(wt_ref[0], act,                             # fused 1x1-conv matmul
                  preferred_element_type=jnp.float32) + bias_ref[0]   # (C, hw_blk)
    m = mask_ref[0]
    den_ref[0] = (init_ref[0] * m + (1.0 - m) * out).astype(den_ref.dtype)


# ----------------------------------------------------------------------------
# CFGDenoiser.forward (JAX/Pallas version)
# ----------------------------------------------------------------------------
def cfg_denoiser_forward(x, sigma, uncond, tensor, conds_list, cond_scale,
                         image_cond, mask, nmask, init_latent, params):
    # nmask == 1 - mask (see processing.py); recomputed in-kernel -> drop the stream.
    del nmask
    Wx, Wi, Wp = params
    B, C, H, W = x.shape
    Ci = image_cond.shape[1]
    HW = H * W
    ncond = tensor.shape[0]

    hp = jax.lax.Precision.HIGHEST   # tiny host-side matmuls: keep them f32-exact

    # ---- per-sample CFG coefficients over the standard-order (cond..., uncond...) rows.
    #      denoised[i] = (1 - cs*sum_j w_ij)*uncond_out[i] + sum_j cs*w_ij*cond_out[idx_ij]
    coefm = np.zeros((B, ncond + B), np.float32)
    for i, conds in enumerate(conds_list):
        wsum = 0.0
        for cond_index, weight in conds:
            ci = int(cond_index)
            assert 0 <= ci < ncond, "cond_index out of range of reconstructed tensor"
            coefm[i, ci] += float(weight) * float(cond_scale)
            wsum += float(weight)
        coefm[i, ncond + i] += 1.0 - float(cond_scale) * wsum   # each row sums to exactly 1

    # ---- per-sample k-diffusion wrapper scalars.
    c_skip = 1.0 / (sigma * sigma + 1.0)                        # (B,)
    c_out = sigma / jnp.sqrt(sigma * sigma + 1.0)               # (B,)

    # ---- cross-attention term collapses to a per-sample per-channel bias, and the whole
    #      CFG combine collapses onto it (rows of x_in for one sample are identical and
    #      the coefficients sum to 1), so x_out is never materialized.
    cond_in = jnp.concatenate([tensor, uncond])                           # (ncond+B, T, D)
    bias_std = jnp.matmul(jnp.mean(cond_in, axis=1), Wp, precision=hp)    # (ncond+B, C)
    bias = c_out[:, None] * jnp.matmul(jnp.asarray(coefm), bias_std, precision=hp)  # (B, C)
    bias_col = bias[..., None].astype(jnp.float32)                        # (B, C, 1)

    # ---- fold c_skip / c_out into one per-sample fused 1x1-conv weight (tiny, host-side):
    #      c_skip_i*x + c_out_i*(Wx^T x + Wi^T ic)  ==  M_i @ [x ; ic]
    wt_shared = jnp.concatenate([Wx, Wi], axis=0).T                       # (C, C+Ci)
    eye = jnp.concatenate([jnp.eye(C, dtype=jnp.float32),
                           jnp.zeros((C, Ci), jnp.float32)], axis=1)      # (C, C+Ci)
    wt = (c_skip[:, None, None] * eye[None, :, :] +
          c_out[:, None, None] * wt_shared[None, :, :]).astype(jnp.float32)  # (B, C, C+Ci)

    # ---- lane-dense (C, HW) activations: contiguous reshapes only, no transposes.
    x_flat = x.reshape(B, C, HW)
    act_in = jnp.concatenate([x_flat, image_cond.reshape(B, Ci, HW)], axis=1)  # (B, C+Ci, HW)
    mask_flat = mask.reshape(B, C, HW)
    init_flat = init_latent.reshape(B, C, HW)

    # ---- grid = (HW blocks, samples).  Only split HW where a 2nd TensorCore exists
    #      (v7x) and each half keeps >=512 lanes; single-TC v5e/v6e keep one big block.
    devs = jax.devices()
    kind = devs[0].device_kind.lower() if devs else ""
    two_tc = ("v7" in kind) or ("7x" in kind)
    if two_tc and HW % 256 == 0 and (HW // 2) >= 512:
        hw_blk = HW // 2
        sem_h = pltpu.CORE_PARALLEL      # shard the two HW halves across the two TCs
    else:
        hw_blk = HW
        sem_h = pltpu.PARALLEL
    hwb = HW // hw_blk

    grid_spec = pltpu.PrefetchScalarGridSpec(
        num_scalar_prefetch=0,
        grid=(hwb, B),
        in_specs=[
            # [x ; image_cond] activations, lane-dense
            pl.BlockSpec((1, C + Ci, hw_blk), lambda h, i: (i, 0, h)),
            # fused per-sample 1x1-conv weight (c_skip/c_out folded in)
            pl.BlockSpec((1, C, C + Ci), lambda h, i: (i, 0, 0)),
            # CFG-combined cross-attention bias column
            pl.BlockSpec((1, C, 1), lambda h, i: (i, 0, 0)),
            # mask / init_latent for the inpainting blend
            pl.BlockSpec((1, C, hw_blk), lambda h, i: (i, 0, h)),
            pl.BlockSpec((1, C, hw_blk), lambda h, i: (i, 0, h)),
        ],
        out_specs=pl.BlockSpec((1, C, hw_blk), lambda h, i: (i, 0, h)),
    )

    den_flat = pl.pallas_call(
        _cfg_denoiser_kernel,
        out_shape=jax.ShapeDtypeStruct((B, C, HW), x.dtype),
        grid_spec=grid_spec,
        compiler_params=pltpu.CompilerParams(
            dimension_semantics=(sem_h, pltpu.PARALLEL)),
    )(act_in, wt, bias_col, mask_flat, init_flat)

    return den_flat.reshape(B, C, H, W)


# ----------------------------------------------------------------------------
# Pure-JAX reference (mirrors the PyTorch module: duplicate x_in, run inner model,
# combine_denoised, inpainting blend)
# ----------------------------------------------------------------------------
def _inner_model_ref(x, sigma, cond, ic, Wx, Wi, Wp):
    N, C, H, W = x.shape
    hp = jax.lax.Precision.HIGHEST
    xf = jnp.transpose(x, (0, 2, 3, 1)).reshape(N, H * W, C)
    icf = jnp.transpose(ic, (0, 2, 3, 1)).reshape(N, H * W, -1)
    c_skip = 1.0 / (sigma ** 2 + 1.0)
    c_out = sigma / jnp.sqrt(sigma ** 2 + 1.0)
    feat = (jnp.matmul(xf, Wx, precision=hp)
            + jnp.matmul(icf, Wi, precision=hp)
            + jnp.matmul(cond.mean(axis=1), Wp, precision=hp)[:, None, :])
    out = c_skip[:, None, None] * xf + c_out[:, None, None] * feat
    return jnp.transpose(out.reshape(N, H, W, C), (0, 3, 1, 2))


def _combine_ref(x_out, conds_list, uncond_b, cond_scale):
    du = x_out[-uncond_b:]
    den = jnp.array(du)
    for i, conds in enumerate(conds_list):
        for ci, w in conds:
            den = den.at[i].add((x_out[ci] - du[i]) * (w * cond_scale))
    return den


# ----------------------------------------------------------------------------
if __name__ == "__main__":
    B, C, H, W = 2, 4, 16, 16
    Ci, T, D = 4, 8, 32
    cond_scale = 7.5

    key = jax.random.PRNGKey(0)
    ks = jax.random.split(key, 10)
    x = jax.random.normal(ks[0], (B, C, H, W), jnp.float32)
    sigma = jnp.array([1.5, 0.7], jnp.float32)
    uncond = jax.random.normal(ks[1], (B, T, D), jnp.float32)

    # multicond batch: 2 weighted conds for sample 0, 1 cond for sample 1
    conds_list = [[(0, 0.7), (1, 0.3)], [(2, 1.0)]]
    ncond = sum(len(c) for c in conds_list)
    tensor = jax.random.normal(ks[2], (ncond, T, D), jnp.float32)

    image_cond = jax.random.normal(ks[3], (B, Ci, H, W), jnp.float32)
    init_latent = jax.random.normal(ks[4], (B, C, H, W), jnp.float32)
    mask = (jax.random.uniform(ks[5], (B, C, H, W)) > 0.5).astype(jnp.float32)
    nmask = 1.0 - mask

    # deterministic synthetic inner-model weights
    Wx = 0.1 * jax.random.normal(ks[6], (C, C), jnp.float32)
    Wi = 0.1 * jax.random.normal(ks[7], (Ci, C), jnp.float32)
    Wp = 0.1 * jax.random.normal(ks[8], (D, C), jnp.float32)

    denoised = cfg_denoiser_forward(
        x, sigma, uncond, tensor, conds_list, cond_scale,
        image_cond, mask, nmask, init_latent, (Wx, Wi, Wp))
    denoised = jax.block_until_ready(denoised)

    # reference (exact PyTorch-path duplication + combine + blend)
    repeats = [len(c) for c in conds_list]
    x_in = jnp.concatenate([jnp.stack([x[i]] * n) for i, n in enumerate(repeats)] + [x])
    ic_in = jnp.concatenate([jnp.stack([image_cond[i]] * n) for i, n in enumerate(repeats)] + [image_cond])
    sg_in = jnp.concatenate([jnp.stack([sigma[i]] * n) for i, n in enumerate(repeats)] + [sigma])
    cond_in = jnp.concatenate([tensor, uncond])
    x_out_ref = _inner_model_ref(x_in, sg_in, cond_in, ic_in, Wx, Wi, Wp)
    den_ref = _combine_ref(x_out_ref, conds_list, uncond.shape[0], cond_scale)
    den_ref = init_latent * mask + nmask * den_ref

    np.testing.assert_allclose(np.asarray(denoised), np.asarray(den_ref),
                               rtol=1e-5, atol=1e-4)
    print("KERNEL_OK")
</pallas_src>

<mosaic_0001>
module attributes {stable_mosaic.version = 11 : i64} {
  func.func @_cfg_denoiser_kernel(%arg0: i32, %arg1: i32, %arg2: memref<1x8x256xf32, #tpu.memory_space<vmem>>, %arg3: memref<1x4x8xf32, #tpu.memory_space<vmem>>, %arg4: memref<1x4x1xf32, #tpu.memory_space<vmem>>, %arg5: memref<1x4x256xf32, #tpu.memory_space<vmem>>, %arg6: memref<1x4x256xf32, #tpu.memory_space<vmem>>, %arg7: memref<1x4x256xf32, #tpu.memory_space<vmem>>) attributes {dimension_semantics = [#tpu.dimension_semantics<parallel>, #tpu.dimension_semantics<parallel>], iteration_bounds = array<i64: 1, 2>, scalar_prefetch = 0 : i64, scratch_operands = 0 : i64, tpu.core_type = #tpu.core_type<tc>, window_params = [{transform_indices = @transform_0, window_bounds = array<i64: 1, 8, 256>}, {transform_indices = @transform_1, window_bounds = array<i64: 1, 4, 8>}, {transform_indices = @transform_2, window_bounds = array<i64: 1, 4, 1>}, {transform_indices = @transform_3, window_bounds = array<i64: 1, 4, 256>}, {transform_indices = @transform_4, window_bounds = array<i64: 1, 4, 256>}, {transform_indices = @transform_5, window_bounds = array<i64: 1, 4, 256>}]} {
    %c0 = arith.constant 0 : index
    %c0_0 = arith.constant 0 : index
    %c0_1 = arith.constant 0 : index
    %0 = vector.load %arg2[%c0, %c0_0, %c0_1] : memref<1x8x256xf32, #tpu.memory_space<vmem>>, vector<1x8x256xf32>
    %1 = vector.shape_cast %0 : vector<1x8x256xf32> to vector<8x256xf32>
    %c0_2 = arith.constant 0 : index
    %c0_3 = arith.constant 0 : index
    %c0_4 = arith.constant 0 : index
    %2 = vector.load %arg3[%c0_2, %c0_3, %c0_4] : memref<1x4x8xf32, #tpu.memory_space<vmem>>, vector<1x4x8xf32>
    %3 = vector.shape_cast %2 : vector<1x4x8xf32> to vector<4x8xf32>
    %cst = arith.constant dense<0.000000e+00> : vector<4x256xf32>
    %4 = tpu.matmul %3, %1, %cst {dimension_numbers = #tpu.dot_dimension_numbers<[1], [0], [0], [1], [0, 0, 1, 1], [], []>} : vector<4x8xf32>, vector<8x256xf32>, vector<4x256xf32> -> vector<4x256xf32>
    %c0_5 = arith.constant 0 : index
    %c0_6 = arith.constant 0 : index
    %c0_7 = arith.constant 0 : index
    %5 = vector.load %arg4[%c0_5, %c0_6, %c0_7] : memref<1x4x1xf32, #tpu.memory_space<vmem>>, vector<1x4x1xf32>
    %6 = vector.shape_cast %5 : vector<1x4x1xf32> to vector<4x1xf32>
    %7 = vector.broadcast %6 : vector<4x1xf32> to vector<4x256xf32>
    %8 = arith.addf %4, %7 : vector<4x256xf32>
    %c0_8 = arith.constant 0 : index
    %c0_9 = arith.constant 0 : index
    %c0_10 = arith.constant 0 : index
    %9 = vector.load %arg5[%c0_8, %c0_9, %c0_10] : memref<1x4x256xf32, #tpu.memory_space<vmem>>, vector<1x4x256xf32>
    %10 = vector.shape_cast %9 : vector<1x4x256xf32> to vector<4x256xf32>
    %c0_11 = arith.constant 0 : index
    %c0_12 = arith.constant 0 : index
    %c0_13 = arith.constant 0 : index
    %11 = vector.load %arg6[%c0_11, %c0_12, %c0_13] : memref<1x4x256xf32, #tpu.memory_space<vmem>>, vector<1x4x256xf32>
    %12 = vector.shape_cast %11 : vector<1x4x256xf32> to vector<4x256xf32>
    %13 = arith.mulf %12, %10 : vector<4x256xf32>
    %cst_14 = arith.constant 1.000000e+00 : f32
    %14 = vector.broadcast %cst_14 : f32 to vector<4x256xf32>
    %15 = arith.subf %14, %10 : vector<4x256xf32>
    %16 = arith.mulf %15, %8 : vector<4x256xf32>
    %17 = arith.addf %13, %16 : vector<4x256xf32>
    %c0_15 = arith.constant 0 : index
    %c0_16 = arith.constant 0 : index
    %c0_17 = arith.constant 0 : index
    %18 = vector.load %arg7[%c0_15, %c0_16, %c0_17] : memref<1x4x256xf32, #tpu.memory_space<vmem>>, vector<1x4x256xf32>
    %19 = vector.shape_cast %18 : vector<1x4x256xf32> to vector<4x256xf32>
    %20 = vector.shape_cast %17 : vector<4x256xf32> to vector<1x4x256xf32>
    tpu.vector_store %arg7[%c0_15, %c0_16, %c0_17], %20 {strides = array<i32>} : memref<1x4x256xf32, #tpu.memory_space<vmem>>, vector<1x4x256xf32>,
    return
  }
  func.func @transform_0(%arg0: i32, %arg1: i32) -> (i32, i32, i32) {
    %c0_i32 = arith.constant 0 : i32
    %c0_i32_0 = arith.constant 0 : i32
    return %arg1, %c0_i32, %arg0 : i32, i32, i32
  }
  func.func @transform_1(%arg0: i32, %arg1: i32) -> (i32, i32, i32) {
    %c0_i32 = arith.constant 0 : i32
    %c0_i32_0 = arith.constant 0 : i32
    %c0_i32_1 = arith.constant 0 : i32
    return %arg1, %c0_i32, %c0_i32_0 : i32, i32, i32
  }
  func.func @transform_2(%arg0: i32, %arg1: i32) -> (i32, i32, i32) {
    %c0_i32 = arith.constant 0 : i32
    %c0_i32_0 = arith.constant 0 : i32
    %c0_i32_1 = arith.constant 0 : i32
    return %arg1, %c0_i32, %c0_i32_0 : i32, i32, i32
  }
  func.func @transform_3(%arg0: i32, %arg1: i32) -> (i32, i32, i32) {
    %c0_i32 = arith.constant 0 : i32
    %c0_i32_0 = arith.constant 0 : i32
    return %arg1, %c0_i32, %arg0 : i32, i32, i32
  }
  func.func @transform_4(%arg0: i32, %arg1: i32) -> (i32, i32, i32) {
    %c0_i32 = arith.constant 0 : i32
    %c0_i32_0 = arith.constant 0 : i32
    return %arg1, %c0_i32, %arg0 : i32, i32, i32
  }
  func.func @transform_5(%arg0: i32, %arg1: i32) -> (i32, i32, i32) {
    %c0_i32 = arith.constant 0 : i32
    %c0_i32_0 = arith.constant 0 : i32
    return %arg1, %c0_i32, %arg0 : i32, i32, i32
  }
}

</mosaic_0001>

<bundles_post_ra>
// kernel: tpu_custom_call.1
= control target key start
LH: loop header
LB: loop body
LE: loop exit
PB: predicated region body
PF: predicated region fallthrough
CT: control target
= control target key end

     0   :  { %s1233_s0 = inlined_call_operand.hbm [shape: f32[2,8,256], index: 0, kind: input, shape index: {}]   ;;  %s1234_s1 = inlined_call_operand.hbm [shape: f32[2,4,8], index: 1, kind: input, shape index: {}]   ;;  %s1235_s2 = inlined_call_operand.vmem [shape: f32[2,4,1], index: 2, kind: input, shape index: {}]   ;;  %s1236_s3 = inlined_call_operand.vmem [shape: f32[2,4,256], index: 3, kind: input, shape index: {}]   ;;  %s1237_s4 = inlined_call_operand.hbm [shape: f32[2,4,256], index: 4, kind: input, shape index: {}]   ;;  %s1238_s5 = inlined_call_operand.hbm [shape: f32[2,4,256], index: 5, kind: output, shape index: {}]  }
   0x1   :  { %1248 = sst [smem:[#allocation17_spill]] %s1233_s0 }
   0x2   :  { %1249 = sst [smem:[#allocation18_spill]] %s1234_s1 }
   0x3   :  { %10 = vsyncpa [#allocation3], 0 }
   0x4   :  { %12 = vsyncpa [#allocation3 + $0x1], 0 }
   0x5   :  { %13 = vsyncpa [#allocation6], 0 }
   0x6   :  { %15 = vsyncpa [#allocation6 + $0x1], 0 }
   0x7   :  { %16 = vsyncpa [#allocation4], 0 }
   0x8   :  { %18 = vsyncpa [#allocation4 + $0x1], 0  ;;  %s982_s18 = smov 0   ;;  %s984_s19 = smov 0  }
   0x9   :  { %s986_s20 = smov 0   ;;  %s988_s21 = smov 0  }
   0xa   :  { %s990_s22 = smov 0   ;;  %s992_s23 = smov 0  }
   0xb LB: > { %1250 = sst [smem:[#allocation12_spill]] %s932_s20  ;;  %s1013_s24 = sadd.s32 4294967295, %s944_s23   ;;  %s944_s23 = sphi %s992_s23, %s24_s23   ;;  %s940_s22 = sphi %s990_s22, %s1282_s22   ;;  %s936_s21 = sphi %s988_s21, %s1281_s21   ;;  %s932_s20 = sphi %s986_s20, %s1277_s20   ;;  %s928_s19 = sphi %s984_s19, %s1280_s19   ;;  %s924_s18 = sphi %s982_s18, %s1279_s18  }
   0xc   : > { %1251 = sst [smem:[#allocation13_spill]] %s944_s23  ;;  %s664_s25 = sadd.s32 4294967294, %s944_s23  }
   0xd   : > { %s33_s26 = sadd.s32 1, %s940_s22  ;;  %s45_s27 = sadd.s32 1, %s932_s20 }
   0xe   : > { %p34_p0 = scmp.ge.s32.totalorder %s33_s26, 2  ;;  %p52_p1 = scmp.ne.s32.totalorder %s932_s20, %s928_s19 }
   0xf   : > { %p53_p2 = scmp.eq.s32.totalorder %s944_s23, 0  ;;  %p58_p3 = scmp.ne.s32.totalorder %s928_s19, %s924_s18 }
  0x10   : > { %s1284_s26 = smov (%p34_p0, %s33_s26), 0  ;;  %p59_p5 = scmp.eq.s32.totalorder %s1013_s24, 0 }
  0x11   : > { %1252 = sst [smem:[#allocation14_spill]] %s1284_s26  ;;  %p1025_p4 = por %p53_p2, %p52_p1 }
  0x12   : > { %s40_s29 = ssub.s32 %s940_s22, %s1284_s26  ;;  %p192_p6 = scmp.eq.s32.totalorder %s1013_s24, 1 }
  0x13   : > { %p43_p7 = scmp.eq.s32.totalorder %s40_s29, 0  ;;  %p1033_p8 = por %p59_p5, %p58_p3 }
  0x14   : > { %p1037_p9 = por %p192_p6, %p52_p1  ;;  %p198_p10 = scmp.eq.s32.totalorder %s664_s25, 1 }
  0x15   : > { %s1254_s30 = scalar_select %p1033_p8, 1, 0 }
  0x16   : > { %s1255_s6 = scalar_select %p1037_p9, 1, 0 }
  0x17   : > { %s1042_s7 = scalar_select %p43_p7, %s932_s20, %s45_s27  }
  0x18   : > { %p1044_p11 = por %p198_p10, %p58_p3  ;;  %p715_p13 = scmp.lt.s32.totalorder %s944_s23, 2 }
  0x19   : > { %1256 = sst [smem:[#allocation15_spill]] %s1042_s7  ;;  %s1051_s9 = sand.u32 1, %s932_s20  }
  0x1a   : > { %s1257_s8 = scalar_select %p1044_p11, 1, 0 }
  0x1b   : > { %s239_s10 = sand.u32 1, %s944_s23   ;;  %s670_s11 = sshll.u32 %s1051_s9, 2 }
  0x1c   : > { %1258 = sst [smem:[#allocation16_spill]] %s1257_s8  ;;  %p1057_p0 = pnand %p715_p13, %p1025_p4 }
  0x1d   : > { %s671_s13 = sshll.u32 %s940_s22, 6  ;;  %s1260_s1 = sld [smem:[#allocation18_spill]] }
  0x1e   : > { %s1259_s12 = scalar_select %p1057_p0, 1, 0 }
  0x1f   : > { %s243_s17 = scalar_lea.vmem [#allocation5], %s670_s11  ;;  %s1071_s27 = scalar_lea.sflag [#allocation6], %s239_s10 }
  0x20   : > { %s250_s25 = sshll.u32 %s243_s17, 4  ;;  %p1077_p4 = pneg %p1057_p0  ;;  %s1068_s25 = int_to_ptr.vmem [resolvable:$true] %s250_s25 }
  0x23   : > { %s1065_s16 = scalar_lea.hbm %s1260_s1, %s671_s13  ;;  %s773_s14 = scalar_lea.hbm %s1260_s1, 128 }
  0x24   : > { %s768_s28 = scalar_lea.hbm %s1065_s16, 64  ;;  %p774_p7 = scmp.lt.u32.totalorder %s1065_s16, %s1260_s1 }
  0x25   : > { %p769_p3 = scmp.ne.s32.totalorder %s1065_s16, %s768_s28  ;;  %p775_p10 = scmp.lt.u32.totalorder %s773_s14, %s768_s28 }
  0x26   : > { %p777_p12 = scmp.lt.u32.totalorder %s768_s28, %s1065_s16 }
  0x27   : > { %p771_p5 = pnand %p1077_p4, %p769_p3  ;;  %p776_p13 = por %p775_p10, %p774_p7 }
  0x29   : > { %p772_p6 = pneg %p771_p5  ;;  %p778_p1 = por %p777_p12, %p776_p13 }
  0x2b   : > { %p779_p2 = pnand %p778_p1, %p772_p6 }
  0x2d   : > { %782 = shalt.err (!%p779_p2)
}
  0x2e   : > { %s783_s10 = scalar_lea.vmem %s1068_s25, 64  ;;  %s946_s13 = smov [#allocation5]  }
  0x2f   : > { %p784_p3 = scmp.ne.s32.totalorder %s1068_s25, %s783_s10  ;;  %s788_s11 = sshll.u32 %s946_s13, 4  ;;  %s789_s11 = int_to_ptr.vmem [resolvable:$false] %s788_s11 }
  0x30   : > { %s790_s15 = scalar_lea.vmem %s789_s11, 128  ;;  %p791_p9 = scmp.lt.s32.totalorder %s1068_s25, %s789_s11 }
  0x31   : > { %p786_p5 = pnand %p784_p3, %p1077_p4  ;;  %p792_p8 = scmp.lt.s32.totalorder %s790_s15, %s783_s10 }
  0x33   : > { %p787_p11 = pneg %p786_p5  ;;  %p793_p7 = por %p792_p8, %p791_p9 }
  0x35   : > { %p794_p10 = pnand %p793_p7, %p787_p11 }
  0x37   : > { %797 = shalt.err (!%p794_p10)
}
  0x38   : > { %707 = dma.hbm_to_vmem [thread:$0]  (!%p1057_p0), %s1065_s16, 64, %s1068_s25, %s1071_s27  }
  0x39   : > { %p1262_p12 = scmp.lt.s32.totalorder %s944_s23, 3  ;;  %p1263_p1 = scmp.ge.s32.totalorder %s944_s23, 1 }
  0x3a   : > { %s667_s14 = sshll.u32 %s1051_s9, 4  ;;  %s689_s17 = sshll.u32 %s940_s22, 8 }
  0x3b   : > { %p1105_p2 = pnand %p1263_p1, %p1262_p12  ;;  %s1265_s0 = sld [smem:[#allocation17_spill]] }
  0x3c   : > { %s222_s15 = scalar_lea.vmem [#allocation2], %s667_s14  ;;  %s219_s25 = scalar_lea.sflag [#allocation3], %s1051_s9 }
  0x3d   : > { %s1264_s28 = scalar_select %p1105_p2, 1, 0 }
  0x3e   : > { %s232_s1 = sshll.u32 %s222_s15, 4  ;;  %s233_s1 = int_to_ptr.vmem [resolvable:$true] %s232_s1 }
  0x41   : > { %s1114_s11 = scalar_lea.hbm %s1265_s0, %s689_s17  ;;  %s803_s10 = scalar_lea.hbm %s1265_s0, 512 }
  0x42   : > { %s798_s26 = scalar_lea.hbm %s1114_s11, 256  ;;  %p804_p6 = scmp.lt.u32.totalorder %s1114_s11, %s1265_s0 }
  0x43   : > { %p799_p8 = scmp.ne.s32.totalorder %s1114_s11, %s798_s26  ;;  %p805_p13 = scmp.lt.u32.totalorder %s803_s10, %s798_s26 }
  0x44   : > { %p807_p5 = scmp.lt.u32.totalorder %s798_s26, %s1114_s11 }
  0x45   : > { %p801_p9 = pnand %p799_p8, %p1077_p4  ;;  %p806_p3 = por %p805_p13, %p804_p6 }
  0x47   : > { %p802_p11 = pneg %p801_p9  ;;  %p808_p7 = por %p807_p5, %p806_p3 }
  0x49   : > { %p809_p10 = pnand %p808_p7, %p802_p11 }
  0x4b   : > { %812 = shalt.err (!%p809_p10)
}
  0x4c   : > { %s813_s14 = scalar_lea.vmem %s233_s1, 256  ;;  %s947_s15 = smov [#allocation2]  }
  0x4d   : > { %p814_p12 = scmp.ne.s32.totalorder %s233_s1, %s813_s14  ;;  %s818_s16 = sshll.u32 %s947_s15, 4  ;;  %s819_s16 = int_to_ptr.vmem [resolvable:$false] %s818_s16 }
  0x4e   : > { %s820_s20 = scalar_lea.vmem %s819_s16, 512  ;;  %p821_p9 = scmp.lt.s32.totalorder %s233_s1, %s819_s16 }
  0x4f   : > { %p816_p1 = pnand %p814_p12, %p1077_p4  ;;  %p822_p2 = scmp.lt.s32.totalorder %s820_s20, %s813_s14 }
  0x51   : > { %p817_p8 = pneg %p816_p1  ;;  %p823_p0 = por %p822_p2, %p821_p9 }
  0x53   : > { %p824_p6 = pnand %p823_p0, %p817_p8 }
  0x55   : > { %827 = shalt.err (!%p824_p6)
}
  0x56   : > { %p1266_p13 = scmp.ne.s32.totalorder %s1259_s12, 0  ;;  %s690_s26 = sshll.u32 %s940_s22, 7 }
  0x57   : > { %s1267_s7 = sshll.u32 %s1051_s9, 3  ;;  %s289_s0 = scalar_lea.hbm %s1237_s4, %s690_s26 }
  0x58   : > { %704 = dma.hbm_to_vmem [thread:$0]  (!%p1266_p13), %s1114_s11, 256, %s233_s1, %s219_s25  }
  0x59   : > { %s281_s10 = scalar_lea.vmem [#allocation7], %s1267_s7  ;;  %s828_s16 = scalar_lea.hbm %s289_s0, 128 }
  0x5a   : > { %s291_s17 = sshll.u32 %s281_s10, 4  ;;  %p829_p2 = scmp.ne.s32.totalorder %s289_s0, %s828_s16  ;;  %s292_s17 = int_to_ptr.vmem [resolvable:$true] %s291_s17 }
  0x5b   : > { %s833_s23 = scalar_lea.hbm %s1237_s4, 256  ;;  %p834_p3 = scmp.lt.u32.totalorder %s289_s0, %s1237_s4 }
  0x5c   : > { %p831_p0 = pnand %p829_p2, %p1077_p4  ;;  %p835_p5 = scmp.lt.u32.totalorder %s833_s23, %s828_s16 }
  0x5d   : > { %p837_p10 = scmp.lt.u32.totalorder %s828_s16, %s289_s0 }
  0x5e   : > { %p832_p11 = pneg %p831_p0  ;;  %p836_p7 = por %p835_p5, %p834_p3 }
  0x60   : > { %p838_p12 = por %p837_p10, %p836_p7 }
  0x62   : > { %p839_p1 = pnand %p838_p12, %p832_p11 }
  0x64   : > { %842 = shalt.err (!%p839_p1)
}
  0x65   : > { %s843_s9 = scalar_lea.vmem %s292_s17, 128  ;;  %s948_s11 = smov [#allocation7]  }
  0x66   : > { %p844_p8 = scmp.ne.s32.totalorder %s292_s17, %s843_s9  ;;  %s848_s25 = sshll.u32 %s948_s11, 4  ;;  %s849_s25 = int_to_ptr.vmem [resolvable:$false] %s848_s25 }
  0x67   : > { %s850_s26 = scalar_lea.vmem %s849_s25, 256  ;;  %p851_p2 = scmp.lt.s32.totalorder %s292_s17, %s849_s25 }
  0x68   : > { %p846_p9 = pnand %p844_p8, %p1077_p4  ;;  %p852_p0 = scmp.lt.s32.totalorder %s850_s26, %s843_s9 }
  0x6a   : > { %p847_p6 = pneg %p846_p9  ;;  %p853_p13 = por %p852_p0, %p851_p2 }
  0x6c   : > { %p854_p3 = pnand %p853_p13, %p847_p6 }
  0x6e   : > { %857 = shalt.err (!%p854_p3)
}
  0x6f   : > { %p1268_p5 = scmp.ne.s32.totalorder %s1259_s12, 0  ;;  %p1269_p11 = scmp.ne.s32.totalorder %s1264_s28, 0 }
  0x70   : > { %s1157_s23 = sand.u32 (!%p1269_p11), 1, %s928_s19   ;;  %p1270_p4 = scmp.ne.s32.totalorder (!%p1269_p11), %s1254_s30, 0 }
  0x71   : > { %710 = dma.hbm_to_vmem [thread:$0]  (!%p1268_p5), %s289_s0, 128, %s292_s17, %s1071_s27  }
  0x72   : > { %300 = sbr.rel (%p1269_p11) target bundleno = 364 (0x16c), region = 40  ;;  %s676_s8 = sshll.u32 (!%p1269_p11), %s1157_s23, 4 }
  0x73   : > { %s303_s29 = scalar_lea.sflag (!%p1269_p11), [#allocation3], %s1157_s23  ;;  %s306_s7 = scalar_lea.vmem (!%p1269_p11), [#allocation2], %s676_s8 }
  0x79   : > { %911 = dma.done.wait (%p1270_p4), %s303_s29, 256  }
  0x7a   : > { %913 = vsyncadd (%p1270_p4), %s303_s29, 4294967040  ;;  %s311_s0 = sand.u32 1, %s1013_s24   ;;  %s677_s12 = sshll.u32 %s1157_s23, 2 }
  0x7b   : > { %s312_s27 = scalar_lea.sflag [#allocation6], %s311_s0  ;;  %s315_s28 = scalar_lea.vmem [#allocation5], %s677_s12 }
  0x7c   : > { %915 = dma.done.wait (%p1270_p4), %s312_s27, 192  }
  0x7d   : > { %917 = vsyncadd (%p1270_p4), %s312_s27, 4294967104  ;;  %p375_p13 = scmp.lt.s32.totalorder %s936_s21, 1  ;;  %v949_v0 = vmov 0.0   ;;  %v950_v1 = vmov 0   ;;  %v392_v2 = vld [vmem:[%s306_s7 + $0x8] sm:$0xff]  ;;  %v391_v3 = vld [vmem:[%s306_s7] sm:$0xff] }
  0x7e   : > { %468 = vmatprep.mubr.f32.mxu0 %v949_v0  ;;  %767 = vset.pattern.permute.xlu0 %v950_v1  ;;  %v393_v4 = vld [vmem:[%s315_s28] sm:$0xf]  ;;  %vm400_vm0 = vcmask 64512   ;;  %s678_s16 = sshll.u32 %s1157_s23, 3  ;;  %s692_s11 = sshll.u32 %s936_s21, 7 }
  0x7f   : > { %s376_s10 = scalar_select %p375_p13, %s936_s21, 1  ;;  %404 = vmatprep.subr.mxu0 %v392_v2 }
  0x80   : > { %405 = vmatpush1.msra.mxu0 %v391_v3  ;;  %s324_s9 = scalar_lea.vmem [#allocation7], %s678_s16  ;;  %s373_s25 = scalar_lea.vmem [#allocation8], %s678_s16 }
  0x81   : > { %s680_s17 = sshll.u32 %s376_s10, 2  ;;  %683 = vmatmul.mubr.msk.f32.vlgmr.msra.gmra.mrb[0].mxu0 %vm400_vm0, %v393_v4  ;;  %s691_s30 = sshll.u32 %s376_s10, 3  ;;  %v476_v9 = vld [vmem:[%s324_s9] sm:$0xff] }
  0x82   : > { %s378_s15 = scalar_lea.vmem %s1235_s2, %s680_s17  ;;  %s387_s1 = scalar_lea.vmem %s1236_s3, %s691_s30 }
  0x83   : > { %v394_v5 = vld [vmem:[%s378_s15] sm:$0xf]  ;;  %s503_s26 = sshll.u32 %s373_s25, 4  ;;  %s1184_s7 = scalar_lea.hbm %s1238_s5, %s692_s11  ;;  %s1186_s26 = int_to_ptr.vmem [resolvable:$true] %s503_s26 }
  0x84   : > { %397 = vperm.xlu0 %767, %v394_v5   ;;  %v475_v7 = vld [vmem:[%s387_s1] sm:$0xff]  ;;  %s487_s0 = scalar_lea.sflag [#allocation4], %s1157_s23  ;;  %s858_s12 = scalar_lea.vmem %s1186_s26, 128 }
  0x85   : > { %v478_v13 = vsub.f32 1.0, %v475_v7  ;;  %v477_v14 = vmul.f32 %v476_v9, %v475_v7  ;;  %p859_p7 = scmp.ne.s32.totalorder %s1186_s26, %s858_s12  ;;  %p1271_p10 = scmp.ne.s32.totalorder %s1255_s6, 0 }
  0x86   : > { %s951_s21 = smov [#allocation8]  }
  0x87   : > { %p860_p12 = pnand %p859_p7, %p1271_p10  ;;  %s862_s27 = sshll.u32 %s951_s21, 4  ;;  %s863_s27 = int_to_ptr.vmem [resolvable:$false] %s862_s27 }
  0x88   : > { %s864_s28 = scalar_lea.vmem %s863_s27, 256  ;;  %p865_p8 = scmp.lt.s32.totalorder %s1186_s26, %s863_s27 }
  0x89   : > { %p861_p1 = pneg %p860_p12  ;;  %p866_p9 = scmp.lt.s32.totalorder %s864_s28, %s858_s12 }
  0x8b   : > { %p867_p6 = por %p866_p9, %p865_p8 }
  0x8d   : > { %p868_p2 = pnand %p867_p6, %p861_p1 }
 0x103   : > { %v398_v6 = vpop.permute.xlu0 %397 }
 0x154   : > { %v470_v8 = vpop.f32.mrb[0].mxu0 }
 0x155   : > { %v471_v10 = vadd.f32 %v470_v8, %v398_v6  ;;  %v472_v11 = vpop.f32.mrb[1].mxu0 }
 0x156   : > { %v473_v12 = vadd.f32 %v472_v11, %v398_v6 }
 0x158   : > { %v481_v15 = vcombine.low %v471_v10, %v473_v12 }
 0x15a   : > { %v483_v16 = vmul.f32 %v481_v15, %v478_v13 }
 0x15c   : > { %v484_v17 = vadd.f32 %v483_v16, %v477_v14 }
 0x15e   : > { %485 = vst [vmem:[%s373_s25] sm:$0xff] %v484_v17 }
 0x15f   : > { %871 = shalt.err (!%p868_p2)
}
 0x160   : > { %s872_s23 = scalar_lea.hbm %s1184_s7, 128  ;;  %s876_s13 = scalar_lea.hbm %s1238_s5, 256 }
 0x161   : > { %p873_p0 = scmp.ne.s32.totalorder %s1184_s7, %s872_s23  ;;  %p877_p11 = scmp.lt.u32.totalorder %s1184_s7, %s1238_s5 }
 0x162   : > { %p878_p4 = scmp.lt.u32.totalorder %s876_s13, %s872_s23  ;;  %p880_p7 = scmp.lt.u32.totalorder %s872_s23, %s1184_s7 }
 0x163   : > { %p874_p3 = pnand %p873_p0, %p1271_p10 }
 0x164   : > { %p879_p13 = por %p878_p4, %p877_p11 }
 0x165   : > { %p875_p5 = pneg %p874_p3 }
 0x166   : > { %p881_p12 = por %p880_p7, %p879_p13 }
 0x168   : > { %p882_p1 = pnand %p881_p12, %p875_p5 }
 0x16a   : > { %885 = shalt.err (!%p882_p1)
}
 0x16b   : > { %699 = dma.vmem_to_hbm [thread:$0]  (%p1271_p10), %s1186_s26, 128, %s1184_s7, %s487_s0  }
 0x16c PF: > { %s1272_s30 = sld [smem:[#allocation16_spill]]  ;;  %s1273_s16 = sld [smem:[#allocation13_spill]] }
 0x16d   : > { %s515_s14 = sand.u32 1, %s924_s18  }
 0x16e   : > { %s516_s20 = scalar_lea.sflag [#allocation4], %s515_s14 }
 0x172   : > { %p1274_p8 = scmp.ne.s32.totalorder %s1272_s30, 0  ;;  %p1275_p9 = scmp.ge.s32.totalorder %s1273_s16, 2 }
 0x174   : > { %p712_p6 = pnand %p1275_p9, %p1274_p8 }
 0x176   : > { %919 = dma.done.wait (!%p712_p6), %s516_s20, 128  }
 0x177   : > { %921 = vsyncadd (!%p712_p6), %s516_s20, 4294967168  ;;  %s24_s23 = sadd.s32 1, %s1273_s16   ;;  %s1276_s1 = sld [smem:[#allocation12_spill]] }
 0x178   : > { %p21_p2 = scmp.ge.s32.totalorder %s24_s23, 4   ;;  %s1277_s20 = sld [smem:[#allocation15_spill]] }
 0x179   : > { %s1278_s6 = sld [smem:[#allocation14_spill]]  ;;  %s1279_s18 = smov %s928_s19 }
 0x17a   : > { %s1281_s21 = smov %s940_s22  ;;  %23 = sbr.rel (!%p21_p2) target bundleno = 11 (0xb), region = 115 }
 0x17d   : > { %s1280_s19 = smov %s1276_s1 }
 0x17f   : > { %s1282_s22 = smov %s1278_s6 }
 0x181   :  { %521 = vsyncpa [#allocation3], 1 }
 0x182   :  { %523 = vsyncpa [#allocation3 + $0x1], 1 }
 0x183   :  { %524 = vsyncpa [#allocation6], 1 }
 0x184   :  { %526 = vsyncpa [#allocation6 + $0x1], 1 }
 0x185   :  { %527 = vsyncpa [#allocation4], 1 }
 0x186   :  { %529 = vsyncpa [#allocation4 + $0x1], 1 }

</bundles_post_ra>
